<compile_context>
chip_gen: v6e
topology: v6e:2x2x1
jax: 0.10.0
libtpu: 0.0.40
codegen_flags: <defaults>
</compile_context>

<pallas_src>
import functools
import math

import jax
import jax.numpy as jnp
import numpy as np
from jax.experimental import pallas as pl
from jax.experimental.pallas import tpu as pltpu


# ----------------------------------------------------------------------------
# helpers
# ----------------------------------------------------------------------------
def _round_up(v: int, m: int) -> int:
    return (v + m - 1) // m * m


def _pad_axis(a, axis, n):
    if a.shape[axis] == n:
        return a
    pads = [(0, 0)] * a.ndim
    pads[axis] = (0, n - a.shape[axis])
    return jnp.pad(a, pads)


def _layernorm(h, g, b, eps=1e-5):
    mu = jnp.mean(h, axis=-1, keepdims=True)
    var = jnp.mean((h - mu) ** 2, axis=-1, keepdims=True)
    return (h - mu) * jax.lax.rsqrt(var + eps) * g + b


def _nbytes(a) -> int:
    return int(np.prod(a.shape)) * jnp.dtype(a.dtype).itemsize


def _vmem_capacity_bytes() -> int:
    try:
        info = pltpu.get_tpu_info()
        cap = getattr(info, "vmem_capacity_bytes", None)
        if cap:
            return int(cap)
    except Exception:
        pass
    return 64 << 20          # conservative (v7x per-TensorCore)


PARAM_ORDER = (
    "in_w", "in_b",
    "att_g", "att_b", "att_w1", "att_b1", "att_w2", "att_b2",
    "mlp_g", "mlp_b", "mlp_w1", "mlp_b1", "mlp_w2", "mlp_b2",
    "out_g", "out_b", "out_w", "out_bias",
)
# weights feeding the MXU (cast to bf16 once in the wrapper)
MXU_KEYS = frozenset(("in_w", "att_w1", "att_w2", "mlp_w1", "mlp_w2", "out_w"))
# large per-layer weights: resident when they fit, streamed otherwise
STREAMABLE_KEYS = ("att_w1", "att_w2", "mlp_w1", "mlp_w2")


# ----------------------------------------------------------------------------
# Pallas kernel: one grid step = (one batch tile, one layer).
# Grid = (batch_tiles [parallel], n_layers [arbitrary, innermost]).
# ----------------------------------------------------------------------------
def _encoder_kernel(
    x_ref,
    in_w_ref, in_b_ref,
    att_g_ref, att_b_ref, att_w1_ref, att_b1_ref, att_w2_ref, att_b2_ref,
    mlp_g_ref, mlp_b_ref, mlp_w1_ref, mlp_b1_ref, mlp_w2_ref, mlp_b2_ref,
    out_g_ref, out_b_ref, out_w_ref, out_bias_ref,
    o_ref,
    h_ref,                               # VMEM scratch: f32 residual carry (TM, H)
    *, mxu_dtype, weights_resident,
):
    layer = pl.program_id(1)
    n_layers = pl.num_programs(1)

    def wsel(ref):
        # resident: full (L, K, N) block -> dynamic slice by layer.
        # streamed: (1, K, N) per-layer block -> index 0.
        return ref[layer] if weights_resident else ref[0]

    # --- layer 0: input projection into the residual carry ---
    @pl.when(layer == 0)
    def _():
        x = x_ref[...].astype(mxu_dtype)
        h_ref[...] = (
            jnp.dot(x, in_w_ref[...], preferred_element_type=jnp.float32)
            + in_b_ref[...]
        )

    h = h_ref[...]                       # f32 residual stream

    # --- gated "attention" branch: LN -> Linear -> ReLU -> Linear -> Sigmoid ---
    z = _layernorm(h, att_g_ref[layer], att_b_ref[layer])
    z = (jnp.dot(z.astype(mxu_dtype), wsel(att_w1_ref),
                 preferred_element_type=jnp.float32) + att_b1_ref[layer])
    z = jnp.maximum(z, 0.0)
    z = (jnp.dot(z.astype(mxu_dtype), wsel(att_w2_ref),
                 preferred_element_type=jnp.float32) + att_b2_ref[layer])
    gate = jax.nn.sigmoid(z)
    # TODO(synk): nn.Dropout omitted (eval-mode identity).
    h = h + h * gate

    # --- MLP branch: LN -> Linear -> ReLU -> Linear ---
    z = _layernorm(h, mlp_g_ref[layer], mlp_b_ref[layer])
    z = (jnp.dot(z.astype(mxu_dtype), wsel(mlp_w1_ref),
                 preferred_element_type=jnp.float32) + mlp_b1_ref[layer])
    z = jnp.maximum(z, 0.0)
    z = (jnp.dot(z.astype(mxu_dtype), wsel(mlp_w2_ref),
                 preferred_element_type=jnp.float32) + mlp_b2_ref[layer])
    h = h + z

    # Dead writeback on the final layer is skipped (output uses local `h`).
    @pl.when(layer != n_layers - 1)
    def _():
        h_ref[...] = h

    # --- last layer: output projection (LN -> Linear), lane-padded N ---
    @pl.when(layer == n_layers - 1)
    def _():
        z = _layernorm(h, out_g_ref[...], out_b_ref[...])
        out = (jnp.dot(z.astype(mxu_dtype), out_w_ref[...],
                       preferred_element_type=jnp.float32) + out_bias_ref[...])
        o_ref[...] = out.astype(o_ref.dtype)


# ----------------------------------------------------------------------------
# wrapper
# ----------------------------------------------------------------------------
def transformer_encoder_forward(x, params, n_layers, *, block_m=512,
                                mxu_dtype=jnp.bfloat16, weights_resident=None):
    assert n_layers >= 1
    batch, input_dim = x.shape
    hidden_dim = params["in_w"].shape[-1]
    out_dim = params["out_w"].shape[-1]
    h4 = params["att_w1"].shape[-1]
    hf = params["mlp_w1"].shape[-1]

    # ---- MXU / lane friendly zero-padding of the narrow dims ----
    in_p = _round_up(input_dim, 128)
    h4_p = _round_up(h4, 128)
    hf_p = _round_up(hf, 128)
    out_p = _round_up(out_dim, 128)

    prepared = dict(params)
    prepared["in_w"] = _pad_axis(params["in_w"], 0, in_p)       # pad K rows
    prepared["att_w1"] = _pad_axis(params["att_w1"], 2, h4_p)   # pad N cols
    prepared["att_b1"] = _pad_axis(params["att_b1"], 2, h4_p)
    prepared["att_w2"] = _pad_axis(params["att_w2"], 1, h4_p)   # pad K rows
    prepared["mlp_w1"] = _pad_axis(params["mlp_w1"], 2, hf_p)
    prepared["mlp_b1"] = _pad_axis(params["mlp_b1"], 2, hf_p)
    prepared["mlp_w2"] = _pad_axis(params["mlp_w2"], 1, hf_p)
    prepared["out_w"] = _pad_axis(params["out_w"], 1, out_p)
    prepared["out_bias"] = _pad_axis(params["out_bias"], 1, out_p)

    # MXU weights cast to bf16 ONCE here (f32 accumulation in the kernel);
    # biases / LayerNorm params stay f32 on the VPU path.
    inputs = {k: (prepared[k].astype(mxu_dtype) if k in MXU_KEYS else prepared[k])
              for k in PARAM_ORDER}

    # Batch tiling: 16-row multiples (bf16 sublane packing), padded & sliced.
    tm = _round_up(batch, 16) if batch <= block_m else block_m
    batch_p = _round_up(batch, tm)
    x_p = _pad_axis(_pad_axis(x, 1, in_p), 0, batch_p)
    n_tiles = batch_p // tm

    # ---- VMEM budgeting / residency decision (generation aware) ----
    vmem_cap = _vmem_capacity_bytes()
    mxu_full = sum(_nbytes(inputs[k]) for k in STREAMABLE_KEYS)
    mxu_per_layer = mxu_full // n_layers
    small_resident = sum(_nbytes(inputs[k]) for k in PARAM_ORDER
                         if k not in STREAMABLE_KEYS)
    io_tiles = tm * in_p * x.dtype.itemsize + tm * out_p * x.dtype.itemsize
    scratch_bytes = tm * hidden_dim * 4
    # in-kernel activation temporaries: f32 intermediates + bf16 MXU copies
    activ_bytes = tm * (hf_p + h4_p + 4 * hidden_dim) * 6

    est_resident = (2 * (small_resident + mxu_full) + 2 * io_tiles
                    + scratch_bytes + activ_bytes)
    est_streamed = (2 * (small_resident + mxu_per_layer) + 2 * io_tiles
                    + scratch_bytes + activ_bytes)

    if weights_resident is None:
        weights_resident = est_resident <= int(0.75 * vmem_cap)
    est = est_resident if weights_resident else est_streamed
    vmem_limit = int(min(max(est + (16 << 20), 48 << 20), int(0.9 * vmem_cap)))

    # ---- BlockSpecs ----
    def resident_spec(a):                # fetched once, stays resident in VMEM
        nd = a.ndim
        return pl.BlockSpec(a.shape, lambda i, l, _nd=nd: (0,) * _nd)

    def layer_spec(a):                   # streamed per layer (double-buffered)
        return pl.BlockSpec((1,) + a.shape[1:], lambda i, l: (l, 0, 0))

    in_specs = [pl.BlockSpec((tm, in_p), lambda i, l: (i, 0))]          # x tile
    for k in PARAM_ORDER:
        if k in STREAMABLE_KEYS and not weights_resident:
            in_specs.append(layer_spec(inputs[k]))
        else:
            in_specs.append(resident_spec(inputs[k]))
    out_spec = pl.BlockSpec((tm, out_p), lambda i, l: (i, 0))

    # ---- advisory cost estimate (padded matmul FLOPs / transcendentals / bytes) ----
    matmul_flops = batch_p * (2 * in_p * hidden_dim
                              + n_layers * 4 * hidden_dim * (h4_p + hf_p)
                              + 2 * hidden_dim * out_p)
    transcendentals = batch_p * (n_layers * (hidden_dim + 2) + 1)
    weight_traffic = mxu_full if weights_resident else mxu_full * n_tiles
    bytes_accessed = (_nbytes(x_p) + batch_p * out_p * x.dtype.itemsize
                      + weight_traffic + small_resident)
    cost = pl.CostEstimate(flops=int(matmul_flops),
                           transcendentals=int(transcendentals),
                           bytes_accessed=int(bytes_accessed))

    # TODO(synk): if weights do not fit resident AND n_tiles is large, a
    # layer-outer / batch-inner grid with an HBM residual carry would stream
    # each layer's weights once total; not implemented here.
    kernel = functools.partial(_encoder_kernel, mxu_dtype=mxu_dtype,
                               weights_resident=bool(weights_resident))
    out = pl.pallas_call(
        kernel,
        out_shape=jax.ShapeDtypeStruct((batch_p, out_p), x.dtype),
        grid_spec=pltpu.PrefetchScalarGridSpec(
            num_scalar_prefetch=0,
            grid=(n_tiles, n_layers),
            in_specs=in_specs,
            out_specs=out_spec,
            scratch_shapes=[pltpu.VMEM((tm, hidden_dim), jnp.float32)],
        ),
        compiler_params=pltpu.CompilerParams(
            dimension_semantics=("parallel", "arbitrary"),
            vmem_limit_bytes=vmem_limit,
        ),
        cost_estimate=cost,
    )(x_p, *[inputs[k] for k in PARAM_ORDER])

    return out[:batch, :out_dim]


# ----------------------------------------------------------------------------
# Deterministic parameter initialization (PyTorch-style uniform for Linear,
# ones/zeros for LayerNorm). Per-layer tensors are stacked on a leading axis.
# ----------------------------------------------------------------------------
def init_params(key, input_dim, hidden_dim, output_dim, n_layers, factor=4):
    def linear(k, fan_in, fan_out):
        k1, k2 = jax.random.split(k)
        bound = 1.0 / math.sqrt(fan_in)
        w = jax.random.uniform(k1, (fan_in, fan_out), jnp.float32, -bound, bound)
        b = jax.random.uniform(k2, (1, fan_out), jnp.float32, -bound, bound)
        return w, b

    keys = jax.random.split(key, 1 + 4 * n_layers + 1)
    h4 = hidden_dim // 4
    hf = hidden_dim * factor

    in_w, in_b = linear(keys[0], input_dim, hidden_dim)

    att_w1, att_b1, att_w2, att_b2 = [], [], [], []
    mlp_w1, mlp_b1, mlp_w2, mlp_b2 = [], [], [], []
    for l in range(n_layers):
        kk = keys[1 + 4 * l: 1 + 4 * (l + 1)]
        w1, b1 = linear(kk[0], hidden_dim, h4)
        w2, b2 = linear(kk[1], h4, hidden_dim)
        att_w1.append(w1); att_b1.append(b1); att_w2.append(w2); att_b2.append(b2)
        w1, b1 = linear(kk[2], hidden_dim, hf)
        w2, b2 = linear(kk[3], hf, hidden_dim)
        mlp_w1.append(w1); mlp_b1.append(b1); mlp_w2.append(w2); mlp_b2.append(b2)

    out_w, out_bias = linear(keys[-1], hidden_dim, output_dim)

    ones_h = jnp.ones((1, hidden_dim), jnp.float32)
    zeros_h = jnp.zeros((1, hidden_dim), jnp.float32)

    return {
        "in_w": in_w, "in_b": in_b,
        "att_g": jnp.stack([ones_h] * n_layers),   # (L, 1, H)
        "att_b": jnp.stack([zeros_h] * n_layers),
        "att_w1": jnp.stack(att_w1), "att_b1": jnp.stack(att_b1),
        "att_w2": jnp.stack(att_w2), "att_b2": jnp.stack(att_b2),
        "mlp_g": jnp.stack([ones_h] * n_layers),
        "mlp_b": jnp.stack([zeros_h] * n_layers),
        "mlp_w1": jnp.stack(mlp_w1), "mlp_b1": jnp.stack(mlp_b1),
        "mlp_w2": jnp.stack(mlp_w2), "mlp_b2": jnp.stack(mlp_b2),
        "out_g": ones_h, "out_b": zeros_h,
        "out_w": out_w, "out_bias": out_bias,
    }


# ----------------------------------------------------------------------------
# Pure-JAX reference (same math, no Pallas). mxu_dtype=None -> full f32;
# mxu_dtype=bf16 mimics the kernel's MXU operand quantization (f32 accumulate).
# ----------------------------------------------------------------------------
def reference_forward(x, p, n_layers, mxu_dtype=None):
    def cast(a):
        return a.astype(mxu_dtype) if mxu_dtype is not None else a

    def mm(a, w):
        return jnp.dot(cast(a), cast(w), preferred_element_type=jnp.float32)

    def ln(h, g, b):
        mu = jnp.mean(h, axis=-1, keepdims=True)
        var = jnp.mean((h - mu) ** 2, axis=-1, keepdims=True)
        return (h - mu) / jnp.sqrt(var + 1e-5) * g + b

    h = mm(x, p["in_w"]) + p["in_b"]
    for l in range(n_layers):
        z = ln(h, p["att_g"][l], p["att_b"][l])
        z = jnp.maximum(mm(z, p["att_w1"][l]) + p["att_b1"][l], 0.0)
        gate = jax.nn.sigmoid(mm(z, p["att_w2"][l]) + p["att_b2"][l])
        h = h + h * gate
        z = ln(h, p["mlp_g"][l], p["mlp_b"][l])
        z = jnp.maximum(mm(z, p["mlp_w1"][l]) + p["mlp_b1"][l], 0.0)
        h = h + (mm(z, p["mlp_w2"][l]) + p["mlp_b2"][l])
    z = ln(h, p["out_g"], p["out_b"])
    return mm(z, p["out_w"]) + p["out_bias"]


if __name__ == "__main__":
    # small, module-consistent shapes
    batch, input_dim, hidden_dim, output_dim, n_layers, factor = 2, 16, 32, 8, 2, 4

    key = jax.random.PRNGKey(0)
    kx, kp = jax.random.split(key)
    x = jax.random.normal(kx, (batch, input_dim), jnp.float32)
    params = init_params(kp, input_dim, hidden_dim, output_dim, n_layers, factor)

    # default (auto residency decision -> resident at these shapes)
    out = transformer_encoder_forward(x, params, n_layers)
    out = jax.block_until_ready(out)
    assert out.shape == (batch, output_dim)

    # also exercise the streamed-weight fallback path
    out_streamed = transformer_encoder_forward(x, params, n_layers,
                                               weights_resident=False)
    out_streamed = jax.block_until_ready(out_streamed)

    # Tight check vs a reference that uses the same bf16 MXU operands.
    ref_bf16 = reference_forward(x, params, n_layers, mxu_dtype=jnp.bfloat16)
    np.testing.assert_allclose(np.asarray(out), np.asarray(ref_bf16),
                               rtol=5e-3, atol=5e-3)
    np.testing.assert_allclose(np.asarray(out_streamed), np.asarray(ref_bf16),
                               rtol=5e-3, atol=5e-3)

    # Loose check vs the full-f32 PyTorch-equivalent math (bf16 MXU operands
    # introduce ~1% error).
    ref_f32 = reference_forward(x, params, n_layers)
    np.testing.assert_allclose(np.asarray(out), np.asarray(ref_f32),
                               rtol=5e-2, atol=5e-2)

    print("KERNEL_OK")
</pallas_src>

<mosaic_0001>
module attributes {stable_mosaic.version = 11 : i64} {
  func.func @_encoder_kernel(%arg0: i32, %arg1: i32, %arg2: memref<16x128xf32, #tpu.memory_space<vmem>>, %arg3: memref<128x32xbf16, #tpu.memory_space<vmem>>, %arg4: memref<1x32xf32, #tpu.memory_space<vmem>>, %arg5: memref<2x1x32xf32, #tpu.memory_space<vmem>>, %arg6: memref<2x1x32xf32, #tpu.memory_space<vmem>>, %arg7: memref<2x32x128xbf16, #tpu.memory_space<vmem>>, %arg8: memref<2x1x128xf32, #tpu.memory_space<vmem>>, %arg9: memref<2x128x32xbf16, #tpu.memory_space<vmem>>, %arg10: memref<2x1x32xf32, #tpu.memory_space<vmem>>, %arg11: memref<2x1x32xf32, #tpu.memory_space<vmem>>, %arg12: memref<2x1x32xf32, #tpu.memory_space<vmem>>, %arg13: memref<2x32x128xbf16, #tpu.memory_space<vmem>>, %arg14: memref<2x1x128xf32, #tpu.memory_space<vmem>>, %arg15: memref<2x128x32xbf16, #tpu.memory_space<vmem>>, %arg16: memref<2x1x32xf32, #tpu.memory_space<vmem>>, %arg17: memref<1x32xf32, #tpu.memory_space<vmem>>, %arg18: memref<1x32xf32, #tpu.memory_space<vmem>>, %arg19: memref<32x128xbf16, #tpu.memory_space<vmem>>, %arg20: memref<1x128xf32, #tpu.memory_space<vmem>>, %arg21: memref<16x128xf32, #tpu.memory_space<vmem>>, %arg22: memref<16x32xf32, #tpu.memory_space<vmem>>) attributes {dimension_semantics = [#tpu.dimension_semantics<parallel>, #tpu.dimension_semantics<arbitrary>], iteration_bounds = array<i64: 1, 2>, scalar_prefetch = 0 : i64, scratch_operands = 1 : i64, tpu.core_type = #tpu.core_type<tc>, window_params = [{transform_indices = @transform_0, window_bounds = array<i64: 16, 128>}, {pipeline_mode = #tpu.pipeline_mode<synchronous>, transform_indices = @transform_1, window_bounds = array<i64: 128, 32>}, {pipeline_mode = #tpu.pipeline_mode<synchronous>, transform_indices = @transform_2, window_bounds = array<i64: 1, 32>}, {pipeline_mode = #tpu.pipeline_mode<synchronous>, transform_indices = @transform_3, window_bounds = array<i64: 2, 1, 32>}, {pipeline_mode = #tpu.pipeline_mode<synchronous>, transform_indices = @transform_4, window_bounds = array<i64: 2, 1, 32>}, {pipeline_mode = #tpu.pipeline_mode<synchronous>, transform_indices = @transform_5, window_bounds = array<i64: 2, 32, 128>}, {pipeline_mode = #tpu.pipeline_mode<synchronous>, transform_indices = @transform_6, window_bounds = array<i64: 2, 1, 128>}, {pipeline_mode = #tpu.pipeline_mode<synchronous>, transform_indices = @transform_7, window_bounds = array<i64: 2, 128, 32>}, {pipeline_mode = #tpu.pipeline_mode<synchronous>, transform_indices = @transform_8, window_bounds = array<i64: 2, 1, 32>}, {pipeline_mode = #tpu.pipeline_mode<synchronous>, transform_indices = @transform_9, window_bounds = array<i64: 2, 1, 32>}, {pipeline_mode = #tpu.pipeline_mode<synchronous>, transform_indices = @transform_10, window_bounds = array<i64: 2, 1, 32>}, {pipeline_mode = #tpu.pipeline_mode<synchronous>, transform_indices = @transform_11, window_bounds = array<i64: 2, 32, 128>}, {pipeline_mode = #tpu.pipeline_mode<synchronous>, transform_indices = @transform_12, window_bounds = array<i64: 2, 1, 128>}, {pipeline_mode = #tpu.pipeline_mode<synchronous>, transform_indices = @transform_13, window_bounds = array<i64: 2, 128, 32>}, {pipeline_mode = #tpu.pipeline_mode<synchronous>, transform_indices = @transform_14, window_bounds = array<i64: 2, 1, 32>}, {pipeline_mode = #tpu.pipeline_mode<synchronous>, transform_indices = @transform_15, window_bounds = array<i64: 1, 32>}, {pipeline_mode = #tpu.pipeline_mode<synchronous>, transform_indices = @transform_16, window_bounds = array<i64: 1, 32>}, {pipeline_mode = #tpu.pipeline_mode<synchronous>, transform_indices = @transform_17, window_bounds = array<i64: 32, 128>}, {pipeline_mode = #tpu.pipeline_mode<synchronous>, transform_indices = @transform_18, window_bounds = array<i64: 1, 128>}, {transform_indices = @transform_19, window_bounds = array<i64: 16, 128>}]} {
    %c0_i32 = arith.constant 0 : i32
    %0 = arith.cmpi eq, %arg1, %c0_i32 : i32
    %1 = arith.extui %0 : i1 to i32
    %c0_i32_0 = arith.constant 0 : i32
    %2 = arith.cmpi ne, %1, %c0_i32_0 : i32
    scf.if %2 {
      %c0_45 = arith.constant 0 : index
      %c0_46 = arith.constant 0 : index
      %118 = vector.load %arg2[%c0_45, %c0_46] : memref<16x128xf32, #tpu.memory_space<vmem>>, vector<16x128xf32>
      %119 = arith.truncf %118 : vector<16x128xf32> to vector<16x128xbf16>
      %c0_47 = arith.constant 0 : index
      %c0_48 = arith.constant 0 : index
      %120 = vector.load %arg3[%c0_47, %c0_48] : memref<128x32xbf16, #tpu.memory_space<vmem>>, vector<128x32xbf16>
      %cst_49 = arith.constant dense<0.000000e+00> : vector<16x32xf32>
      %121 = tpu.matmul %119, %120, %cst_49 {dimension_numbers = #tpu.dot_dimension_numbers<[1], [0], [0], [1], [0, 0, 1, 1], [], []>} : vector<16x128xbf16>, vector<128x32xbf16>, vector<16x32xf32> -> vector<16x32xf32>
      %c0_50 = arith.constant 0 : index
      %c0_51 = arith.constant 0 : index
      %122 = vector.load %arg4[%c0_50, %c0_51] : memref<1x32xf32, #tpu.memory_space<vmem>>, vector<1x32xf32>
      %123 = vector.broadcast %122 : vector<1x32xf32> to vector<16x32xf32>
      %124 = arith.addf %121, %123 : vector<16x32xf32>
      %c0_52 = arith.constant 0 : index
      %c0_53 = arith.constant 0 : index
      %125 = vector.load %arg22[%c0_52, %c0_53] : memref<16x32xf32, #tpu.memory_space<vmem>>, vector<16x32xf32>
      tpu.vector_store %arg22[%c0_52, %c0_53], %124 {strides = array<i32>} : memref<16x32xf32, #tpu.memory_space<vmem>>, vector<16x32xf32>,
    } else {
    }
    %c0 = arith.constant 0 : index
    %c0_1 = arith.constant 0 : index
    %3 = vector.load %arg22[%c0, %c0_1] : memref<16x32xf32, #tpu.memory_space<vmem>>, vector<16x32xf32>
    %4 = arith.index_cast %arg1 : i32 to index
    %c0_2 = arith.constant 0 : index
    %c0_3 = arith.constant 0 : index
    %5 = vector.load %arg5[%4, %c0_2, %c0_3] : memref<2x1x32xf32, #tpu.memory_space<vmem>>, vector<1x1x32xf32>
    %6 = vector.shape_cast %5 : vector<1x1x32xf32> to vector<1x32xf32>
    %7 = arith.index_cast %arg1 : i32 to index
    %c0_4 = arith.constant 0 : index
    %c0_5 = arith.constant 0 : index
    %8 = vector.load %arg6[%7, %c0_4, %c0_5] : memref<2x1x32xf32, #tpu.memory_space<vmem>>, vector<1x1x32xf32>
    %9 = vector.shape_cast %8 : vector<1x1x32xf32> to vector<1x32xf32>
    %cst = arith.constant dense<0.000000e+00> : vector<16xf32>
    %10 = vector.multi_reduction <add>, %3, %cst [1] : vector<16x32xf32> to vector<16xf32>
    %11 = vector.shape_cast %10 : vector<16xf32> to vector<16x1xf32>
    %cst_6 = arith.constant 3.200000e+01 : f32
    %12 = vector.broadcast %cst_6 : f32 to vector<16x1xf32>
    %13 = arith.divf %11, %12 : vector<16x1xf32>
    %14 = vector.broadcast %13 : vector<16x1xf32> to vector<16x32xf32>
    %15 = arith.subf %3, %14 : vector<16x32xf32>
    %16 = arith.mulf %15, %15 : vector<16x32xf32>
    %cst_7 = arith.constant dense<0.000000e+00> : vector<16xf32>
    %17 = vector.multi_reduction <add>, %16, %cst_7 [1] : vector<16x32xf32> to vector<16xf32>
    %18 = vector.shape_cast %17 : vector<16xf32> to vector<16x1xf32>
    %cst_8 = arith.constant 3.200000e+01 : f32
    %19 = vector.broadcast %cst_8 : f32 to vector<16x1xf32>
    %20 = arith.divf %18, %19 : vector<16x1xf32>
    %21 = vector.broadcast %13 : vector<16x1xf32> to vector<16x32xf32>
    %22 = arith.subf %3, %21 : vector<16x32xf32>
    %cst_9 = arith.constant 9.99999974E-6 : f32
    %23 = vector.broadcast %cst_9 : f32 to vector<16x1xf32>
    %24 = arith.addf %20, %23 : vector<16x1xf32>
    %25 = math.rsqrt %24 : vector<16x1xf32>
    %26 = vector.broadcast %25 : vector<16x1xf32> to vector<16x32xf32>
    %27 = arith.mulf %22, %26 : vector<16x32xf32>
    %28 = vector.broadcast %6 : vector<1x32xf32> to vector<16x32xf32>
    %29 = arith.mulf %27, %28 : vector<16x32xf32>
    %30 = vector.broadcast %9 : vector<1x32xf32> to vector<16x32xf32>
    %31 = arith.addf %29, %30 : vector<16x32xf32>
    %32 = arith.truncf %31 : vector<16x32xf32> to vector<16x32xbf16>
    %33 = arith.index_cast %arg1 : i32 to index
    %c0_10 = arith.constant 0 : index
    %c0_11 = arith.constant 0 : index
    %34 = vector.load %arg7[%33, %c0_10, %c0_11] : memref<2x32x128xbf16, #tpu.memory_space<vmem>>, vector<1x32x128xbf16>
    %35 = vector.shape_cast %34 : vector<1x32x128xbf16> to vector<32x128xbf16>
    %cst_12 = arith.constant dense<0.000000e+00> : vector<16x128xf32>
    %36 = tpu.matmul %32, %35, %cst_12 {dimension_numbers = #tpu.dot_dimension_numbers<[1], [0], [0], [1], [0, 0, 1, 1], [], []>} : vector<16x32xbf16>, vector<32x128xbf16>, vector<16x128xf32> -> vector<16x128xf32>
    %37 = arith.index_cast %arg1 : i32 to index
    %c0_13 = arith.constant 0 : index
    %c0_14 = arith.constant 0 : index
    %38 = vector.load %arg8[%37, %c0_13, %c0_14] : memref<2x1x128xf32, #tpu.memory_space<vmem>>, vector<1x1x128xf32>
    %39 = vector.shape_cast %38 : vector<1x1x128xf32> to vector<1x128xf32>
    %40 = vector.broadcast %39 : vector<1x128xf32> to vector<16x128xf32>
    %41 = arith.addf %36, %40 : vector<16x128xf32>
    %cst_15 = arith.constant 0.000000e+00 : f32
    %42 = vector.broadcast %cst_15 : f32 to vector<16x128xf32>
    %43 = arith.maximumf %41, %42 : vector<16x128xf32>
    %44 = arith.truncf %43 : vector<16x128xf32> to vector<16x128xbf16>
    %45 = arith.index_cast %arg1 : i32 to index
    %c0_16 = arith.constant 0 : index
    %c0_17 = arith.constant 0 : index
    %46 = vector.load %arg9[%45, %c0_16, %c0_17] : memref<2x128x32xbf16, #tpu.memory_space<vmem>>, vector<1x128x32xbf16>
    %47 = vector.shape_cast %46 : vector<1x128x32xbf16> to vector<128x32xbf16>
    %cst_18 = arith.constant dense<0.000000e+00> : vector<16x32xf32>
    %48 = tpu.matmul %44, %47, %cst_18 {dimension_numbers = #tpu.dot_dimension_numbers<[1], [0], [0], [1], [0, 0, 1, 1], [], []>} : vector<16x128xbf16>, vector<128x32xbf16>, vector<16x32xf32> -> vector<16x32xf32>
    %49 = arith.index_cast %arg1 : i32 to index
    %c0_19 = arith.constant 0 : index
    %c0_20 = arith.constant 0 : index
    %50 = vector.load %arg10[%49, %c0_19, %c0_20] : memref<2x1x32xf32, #tpu.memory_space<vmem>>, vector<1x1x32xf32>
    %51 = vector.shape_cast %50 : vector<1x1x32xf32> to vector<1x32xf32>
    %52 = vector.broadcast %51 : vector<1x32xf32> to vector<16x32xf32>
    %53 = arith.addf %48, %52 : vector<16x32xf32>
    %54 = arith.negf %53 : vector<16x32xf32>
    %55 = math.exp %54 : vector<16x32xf32>
    %cst_21 = arith.constant 1.000000e+00 : f32
    %56 = vector.broadcast %cst_21 : f32 to vector<16x32xf32>
    %57 = arith.addf %56, %55 : vector<16x32xf32>
    %58 = arith.divf %56, %57 : vector<16x32xf32>
    %59 = arith.mulf %3, %58 : vector<16x32xf32>
    %60 = arith.addf %3, %59 : vector<16x32xf32>
    %61 = arith.index_cast %arg1 : i32 to index
    %c0_22 = arith.constant 0 : index
    %c0_23 = arith.constant 0 : index
    %62 = vector.load %arg11[%61, %c0_22, %c0_23] : memref<2x1x32xf32, #tpu.memory_space<vmem>>, vector<1x1x32xf32>
    %63 = vector.shape_cast %62 : vector<1x1x32xf32> to vector<1x32xf32>
    %64 = arith.index_cast %arg1 : i32 to index
    %c0_24 = arith.constant 0 : index
    %c0_25 = arith.constant 0 : index
    %65 = vector.load %arg12[%64, %c0_24, %c0_25] : memref<2x1x32xf32, #tpu.memory_space<vmem>>, vector<1x1x32xf32>
    %66 = vector.shape_cast %65 : vector<1x1x32xf32> to vector<1x32xf32>
    %cst_26 = arith.constant dense<0.000000e+00> : vector<16xf32>
    %67 = vector.multi_reduction <add>, %60, %cst_26 [1] : vector<16x32xf32> to vector<16xf32>
    %68 = vector.shape_cast %67 : vector<16xf32> to vector<16x1xf32>
    %cst_27 = arith.constant 3.200000e+01 : f32
    %69 = vector.broadcast %cst_27 : f32 to vector<16x1xf32>
    %70 = arith.divf %68, %69 : vector<16x1xf32>
    %71 = vector.broadcast %70 : vector<16x1xf32> to vector<16x32xf32>
    %72 = arith.subf %60, %71 : vector<16x32xf32>
    %73 = arith.mulf %72, %72 : vector<16x32xf32>
    %cst_28 = arith.constant dense<0.000000e+00> : vector<16xf32>
    %74 = vector.multi_reduction <add>, %73, %cst_28 [1] : vector<16x32xf32> to vector<16xf32>
    %75 = vector.shape_cast %74 : vector<16xf32> to vector<16x1xf32>
    %cst_29 = arith.constant 3.200000e+01 : f32
    %76 = vector.broadcast %cst_29 : f32 to vector<16x1xf32>
    %77 = arith.divf %75, %76 : vector<16x1xf32>
    %78 = vector.broadcast %70 : vector<16x1xf32> to vector<16x32xf32>
    %79 = arith.subf %60, %78 : vector<16x32xf32>
    %cst_30 = arith.constant 9.99999974E-6 : f32
    %80 = vector.broadcast %cst_30 : f32 to vector<16x1xf32>
    %81 = arith.addf %77, %80 : vector<16x1xf32>
    %82 = math.rsqrt %81 : vector<16x1xf32>
    %83 = vector.broadcast %82 : vector<16x1xf32> to vector<16x32xf32>
    %84 = arith.mulf %79, %83 : vector<16x32xf32>
    %85 = vector.broadcast %63 : vector<1x32xf32> to vector<16x32xf32>
    %86 = arith.mulf %84, %85 : vector<16x32xf32>
    %87 = vector.broadcast %66 : vector<1x32xf32> to vector<16x32xf32>
    %88 = arith.addf %86, %87 : vector<16x32xf32>
    %89 = arith.truncf %88 : vector<16x32xf32> to vector<16x32xbf16>
    %90 = arith.index_cast %arg1 : i32 to index
    %c0_31 = arith.constant 0 : index
    %c0_32 = arith.constant 0 : index
    %91 = vector.load %arg13[%90, %c0_31, %c0_32] : memref<2x32x128xbf16, #tpu.memory_space<vmem>>, vector<1x32x128xbf16>
    %92 = vector.shape_cast %91 : vector<1x32x128xbf16> to vector<32x128xbf16>
    %cst_33 = arith.constant dense<0.000000e+00> : vector<16x128xf32>
    %93 = tpu.matmul %89, %92, %cst_33 {dimension_numbers = #tpu.dot_dimension_numbers<[1], [0], [0], [1], [0, 0, 1, 1], [], []>} : vector<16x32xbf16>, vector<32x128xbf16>, vector<16x128xf32> -> vector<16x128xf32>
    %94 = arith.index_cast %arg1 : i32 to index
    %c0_34 = arith.constant 0 : index
    %c0_35 = arith.constant 0 : index
    %95 = vector.load %arg14[%94, %c0_34, %c0_35] : memref<2x1x128xf32, #tpu.memory_space<vmem>>, vector<1x1x128xf32>
    %96 = vector.shape_cast %95 : vector<1x1x128xf32> to vector<1x128xf32>
    %97 = vector.broadcast %96 : vector<1x128xf32> to vector<16x128xf32>
    %98 = arith.addf %93, %97 : vector<16x128xf32>
    %cst_36 = arith.constant 0.000000e+00 : f32
    %99 = vector.broadcast %cst_36 : f32 to vector<16x128xf32>
    %100 = arith.maximumf %98, %99 : vector<16x128xf32>
    %101 = arith.truncf %100 : vector<16x128xf32> to vector<16x128xbf16>
    %102 = arith.index_cast %arg1 : i32 to index
    %c0_37 = arith.constant 0 : index
    %c0_38 = arith.constant 0 : index
    %103 = vector.load %arg15[%102, %c0_37, %c0_38] : memref<2x128x32xbf16, #tpu.memory_space<vmem>>, vector<1x128x32xbf16>
    %104 = vector.shape_cast %103 : vector<1x128x32xbf16> to vector<128x32xbf16>
    %cst_39 = arith.constant dense<0.000000e+00> : vector<16x32xf32>
    %105 = tpu.matmul %101, %104, %cst_39 {dimension_numbers = #tpu.dot_dimension_numbers<[1], [0], [0], [1], [0, 0, 1, 1], [], []>} : vector<16x128xbf16>, vector<128x32xbf16>, vector<16x32xf32> -> vector<16x32xf32>
    %106 = arith.index_cast %arg1 : i32 to index
    %c0_40 = arith.constant 0 : index
    %c0_41 = arith.constant 0 : index
    %107 = vector.load %arg16[%106, %c0_40, %c0_41] : memref<2x1x32xf32, #tpu.memory_space<vmem>>, vector<1x1x32xf32>
    %108 = vector.shape_cast %107 : vector<1x1x32xf32> to vector<1x32xf32>
    %109 = vector.broadcast %108 : vector<1x32xf32> to vector<16x32xf32>
    %110 = arith.addf %105, %109 : vector<16x32xf32>
    %111 = arith.addf %60, %110 : vector<16x32xf32>
    %c1_i32 = arith.constant 1 : i32
    %112 = arith.cmpi ne, %arg1, %c1_i32 : i32
    %113 = arith.extui %112 : i1 to i32
    %c0_i32_42 = arith.constant 0 : i32
    %114 = arith.cmpi ne, %113, %c0_i32_42 : i32
    scf.if %114 {
      %c0_45 = arith.constant 0 : index
      %c0_46 = arith.constant 0 : index
      %118 = vector.load %arg22[%c0_45, %c0_46] : memref<16x32xf32, #tpu.memory_space<vmem>>, vector<16x32xf32>
      tpu.vector_store %arg22[%c0_45, %c0_46], %111 {strides = array<i32>} : memref<16x32xf32, #tpu.memory_space<vmem>>, vector<16x32xf32>,
    } else {
    }
    %c1_i32_43 = arith.constant 1 : i32
    %115 = arith.cmpi eq, %arg1, %c1_i32_43 : i32
    %116 = arith.extui %115 : i1 to i32
    %c0_i32_44 = arith.constant 0 : i32
    %117 = arith.cmpi ne, %116, %c0_i32_44 : i32
    scf.if %117 {
      %c0_45 = arith.constant 0 : index
      %c0_46 = arith.constant 0 : index
      %118 = vector.load %arg17[%c0_45, %c0_46] : memref<1x32xf32, #tpu.memory_space<vmem>>, vector<1x32xf32>
      %c0_47 = arith.constant 0 : index
      %c0_48 = arith.constant 0 : index
      %119 = vector.load %arg18[%c0_47, %c0_48] : memref<1x32xf32, #tpu.memory_space<vmem>>, vector<1x32xf32>
      %cst_49 = arith.constant dense<0.000000e+00> : vector<16xf32>
      %120 = vector.multi_reduction <add>, %111, %cst_49 [1] : vector<16x32xf32> to vector<16xf32>
      %121 = vector.shape_cast %120 : vector<16xf32> to vector<16x1xf32>
      %cst_50 = arith.constant 3.200000e+01 : f32
      %122 = vector.broadcast %cst_50 : f32 to vector<16x1xf32>
      %123 = arith.divf %121, %122 : vector<16x1xf32>
      %124 = vector.broadcast %123 : vector<16x1xf32> to vector<16x32xf32>
      %125 = arith.subf %111, %124 : vector<16x32xf32>
      %126 = arith.mulf %125, %125 : vector<16x32xf32>
      %cst_51 = arith.constant dense<0.000000e+00> : vector<16xf32>
      %127 = vector.multi_reduction <add>, %126, %cst_51 [1] : vector<16x32xf32> to vector<16xf32>
      %128 = vector.shape_cast %127 : vector<16xf32> to vector<16x1xf32>
      %cst_52 = arith.constant 3.200000e+01 : f32
      %129 = vector.broadcast %cst_52 : f32 to vector<16x1xf32>
      %130 = arith.divf %128, %129 : vector<16x1xf32>
      %131 = vector.broadcast %123 : vector<16x1xf32> to vector<16x32xf32>
      %132 = arith.subf %111, %131 : vector<16x32xf32>
      %cst_53 = arith.constant 9.99999974E-6 : f32
      %133 = vector.broadcast %cst_53 : f32 to vector<16x1xf32>
      %134 = arith.addf %130, %133 : vector<16x1xf32>
      %135 = math.rsqrt %134 : vector<16x1xf32>
      %136 = vector.broadcast %135 : vector<16x1xf32> to vector<16x32xf32>
      %137 = arith.mulf %132, %136 : vector<16x32xf32>
      %138 = vector.broadcast %118 : vector<1x32xf32> to vector<16x32xf32>
      %139 = arith.mulf %137, %138 : vector<16x32xf32>
      %140 = vector.broadcast %119 : vector<1x32xf32> to vector<16x32xf32>
      %141 = arith.addf %139, %140 : vector<16x32xf32>
      %142 = arith.truncf %141 : vector<16x32xf32> to vector<16x32xbf16>
      %c0_54 = arith.constant 0 : index
      %c0_55 = arith.constant 0 : index
      %143 = vector.load %arg19[%c0_54, %c0_55] : memref<32x128xbf16, #tpu.memory_space<vmem>>, vector<32x128xbf16>
      %cst_56 = arith.constant dense<0.000000e+00> : vector<16x128xf32>
      %144 = tpu.matmul %142, %143, %cst_56 {dimension_numbers = #tpu.dot_dimension_numbers<[1], [0], [0], [1], [0, 0, 1, 1], [], []>} : vector<16x32xbf16>, vector<32x128xbf16>, vector<16x128xf32> -> vector<16x128xf32>
      %c0_57 = arith.constant 0 : index
      %c0_58 = arith.constant 0 : index
      %145 = vector.load %arg20[%c0_57, %c0_58] : memref<1x128xf32, #tpu.memory_space<vmem>>, vector<1x128xf32>
      %146 = vector.broadcast %145 : vector<1x128xf32> to vector<16x128xf32>
      %147 = arith.addf %144, %146 : vector<16x128xf32>
      %c0_59 = arith.constant 0 : index
      %c0_60 = arith.constant 0 : index
      %148 = vector.load %arg21[%c0_59, %c0_60] : memref<16x128xf32, #tpu.memory_space<vmem>>, vector<16x128xf32>
      tpu.vector_store %arg21[%c0_59, %c0_60], %147 {strides = array<i32>} : memref<16x128xf32, #tpu.memory_space<vmem>>, vector<16x128xf32>,
    } else {
    }
    return
  }
  func.func @transform_0(%arg0: i32, %arg1: i32) -> (i32, i32) {
    %c0_i32 = arith.constant 0 : i32
    %c0_i32_0 = arith.constant 0 : i32
    return %arg0, %c0_i32 : i32, i32
  }
  func.func @transform_1(%arg0: i32, %arg1: i32) -> (i32, i32) {
    %c0_i32 = arith.constant 0 : i32
    %c0_i32_0 = arith.constant 0 : i32
    %c0_i32_1 = arith.constant 0 : i32
    return %c0_i32, %c0_i32_0 : i32, i32
  }
  func.func @transform_2(%arg0: i32, %arg1: i32) -> (i32, i32) {
    %c0_i32 = arith.constant 0 : i32
    %c0_i32_0 = arith.constant 0 : i32
    %c0_i32_1 = arith.constant 0 : i32
    return %c0_i32, %c0_i32_0 : i32, i32
  }
  func.func @transform_3(%arg0: i32, %arg1: i32) -> (i32, i32, i32) {
    %c0_i32 = arith.constant 0 : i32
    %c0_i32_0 = arith.constant 0 : i32
    %c0_i32_1 = arith.constant 0 : i32
    %c0_i32_2 = arith.constant 0 : i32
    return %c0_i32, %c0_i32_0, %c0_i32_1 : i32, i32, i32
  }
  func.func @transform_4(%arg0: i32, %arg1: i32) -> (i32, i32, i32) {
    %c0_i32 = arith.constant 0 : i32
    %c0_i32_0 = arith.constant 0 : i32
    %c0_i32_1 = arith.constant 0 : i32
    %c0_i32_2 = arith.constant 0 : i32
    return %c0_i32, %c0_i32_0, %c0_i32_1 : i32, i32, i32
  }
  func.func @transform_5(%arg0: i32, %arg1: i32) -> (i32, i32, i32) {
    %c0_i32 = arith.constant 0 : i32
    %c0_i32_0 = arith.constant 0 : i32
    %c0_i32_1 = arith.constant 0 : i32
    %c0_i32_2 = arith.constant 0 : i32
    return %c0_i32, %c0_i32_0, %c0_i32_1 : i32, i32, i32
  }
  func.func @transform_6(%arg0: i32, %arg1: i32) -> (i32, i32, i32) {
    %c0_i32 = arith.constant 0 : i32
    %c0_i32_0 = arith.constant 0 : i32
    %c0_i32_1 = arith.constant 0 : i32
    %c0_i32_2 = arith.constant 0 : i32
    return %c0_i32, %c0_i32_0, %c0_i32_1 : i32, i32, i32
  }
  func.func @transform_7(%arg0: i32, %arg1: i32) -> (i32, i32, i32) {
    %c0_i32 = arith.constant 0 : i32
    %c0_i32_0 = arith.constant 0 : i32
    %c0_i32_1 = arith.constant 0 : i32
    %c0_i32_2 = arith.constant 0 : i32
    return %c0_i32, %c0_i32_0, %c0_i32_1 : i32, i32, i32
  }
  func.func @transform_8(%arg0: i32, %arg1: i32) -> (i32, i32, i32) {
    %c0_i32 = arith.constant 0 : i32
    %c0_i32_0 = arith.constant 0 : i32
    %c0_i32_1 = arith.constant 0 : i32
    %c0_i32_2 = arith.constant 0 : i32
    return %c0_i32, %c0_i32_0, %c0_i32_1 : i32, i32, i32
  }
  func.func @transform_9(%arg0: i32, %arg1: i32) -> (i32, i32, i32) {
    %c0_i32 = arith.constant 0 : i32
    %c0_i32_0 = arith.constant 0 : i32
    %c0_i32_1 = arith.constant 0 : i32
    %c0_i32_2 = arith.constant 0 : i32
    return %c0_i32, %c0_i32_0, %c0_i32_1 : i32, i32, i32
  }
  func.func @transform_10(%arg0: i32, %arg1: i32) -> (i32, i32, i32) {
    %c0_i32 = arith.constant 0 : i32
    %c0_i32_0 = arith.constant 0 : i32
    %c0_i32_1 = arith.constant 0 : i32
    %c0_i32_2 = arith.constant 0 : i32
    return %c0_i32, %c0_i32_0, %c0_i32_1 : i32, i32, i32
  }
  func.func @transform_11(%arg0: i32, %arg1: i32) -> (i32, i32, i32) {
    %c0_i32 = arith.constant 0 : i32
    %c0_i32_0 = arith.constant 0 : i32
    %c0_i32_1 = arith.constant 0 : i32
    %c0_i32_2 = arith.constant 0 : i32
    return %c0_i32, %c0_i32_0, %c0_i32_1 : i32, i32, i32
  }
  func.func @transform_12(%arg0: i32, %arg1: i32) -> (i32, i32, i32) {
    %c0_i32 = arith.constant 0 : i32
    %c0_i32_0 = arith.constant 0 : i32
    %c0_i32_1 = arith.constant 0 : i32
    %c0_i32_2 = arith.constant 0 : i32
    return %c0_i32, %c0_i32_0, %c0_i32_1 : i32, i32, i32
  }
  func.func @transform_13(%arg0: i32, %arg1: i32) -> (i32, i32, i32) {
    %c0_i32 = arith.constant 0 : i32
    %c0_i32_0 = arith.constant 0 : i32
    %c0_i32_1 = arith.constant 0 : i32
    %c0_i32_2 = arith.constant 0 : i32
    return %c0_i32, %c0_i32_0, %c0_i32_1 : i32, i32, i32
  }
  func.func @transform_14(%arg0: i32, %arg1: i32) -> (i32, i32, i32) {
    %c0_i32 = arith.constant 0 : i32
    %c0_i32_0 = arith.constant 0 : i32
    %c0_i32_1 = arith.constant 0 : i32
    %c0_i32_2 = arith.constant 0 : i32
    return %c0_i32, %c0_i32_0, %c0_i32_1 : i32, i32, i32
  }
  func.func @transform_15(%arg0: i32, %arg1: i32) -> (i32, i32) {
    %c0_i32 = arith.constant 0 : i32
    %c0_i32_0 = arith.constant 0 : i32
    %c0_i32_1 = arith.constant 0 : i32
    return %c0_i32, %c0_i32_0 : i32, i32
  }
  func.func @transform_16(%arg0: i32, %arg1: i32) -> (i32, i32) {
    %c0_i32 = arith.constant 0 : i32
    %c0_i32_0 = arith.constant 0 : i32
    %c0_i32_1 = arith.constant 0 : i32
    return %c0_i32, %c0_i32_0 : i32, i32
  }
  func.func @transform_17(%arg0: i32, %arg1: i32) -> (i32, i32) {
    %c0_i32 = arith.constant 0 : i32
    %c0_i32_0 = arith.constant 0 : i32
    %c0_i32_1 = arith.constant 0 : i32
    return %c0_i32, %c0_i32_0 : i32, i32
  }
  func.func @transform_18(%arg0: i32, %arg1: i32) -> (i32, i32) {
    %c0_i32 = arith.constant 0 : i32
    %c0_i32_0 = arith.constant 0 : i32
    %c0_i32_1 = arith.constant 0 : i32
    return %c0_i32, %c0_i32_0 : i32, i32
  }
  func.func @transform_19(%arg0: i32, %arg1: i32) -> (i32, i32) {
    %c0_i32 = arith.constant 0 : i32
    %c0_i32_0 = arith.constant 0 : i32
    return %arg0, %c0_i32 : i32, i32
  }
}

</mosaic_0001>

<bundles_post_ra>
// kernel: tpu_custom_call.1
= control target key start
LH: loop header
LB: loop body
LE: loop exit
PB: predicated region body
PF: predicated region fallthrough
CT: control target
= control target key end

     0   :  { %s2108_s0 = inlined_call_operand.vmem [shape: f32[16,128], index: 0, kind: input, shape index: {}]   ;;  %s2109_s1 = inlined_call_operand.vmem [shape: bf16[128,32], index: 1, kind: input, shape index: {}]   ;;  %s2110_s2 = inlined_call_operand.vmem [shape: f32[1,32], index: 2, kind: input, shape index: {}]   ;;  %s2111_s3 = inlined_call_operand.vmem [shape: f32[2,1,32], index: 3, kind: input, shape index: {}]   ;;  %s2112_s4 = inlined_call_operand.vmem [shape: f32[2,1,32], index: 4, kind: input, shape index: {}]   ;;  %s2113_s5 = inlined_call_operand.vmem [shape: bf16[2,32,128], index: 5, kind: input, shape index: {}]   ;;  %s2114_s6 = inlined_call_operand.vmem [shape: f32[2,1,128], index: 6, kind: input, shape index: {}]   ;;  %s2115_s7 = inlined_call_operand.vmem [shape: bf16[2,128,32], index: 7, kind: input, shape index: {}]   ;;  %s2116_s8 = inlined_call_operand.vmem [shape: f32[2,1,32], index: 8, kind: input, shape index: {}]   ;;  %s2117_s9 = inlined_call_operand.vmem [shape: f32[2,1,32], index: 9, kind: input, shape index: {}]   ;;  %s2118_s10 = inlined_call_operand.vmem [shape: f32[2,1,32], index: 10, kind: input, shape index: {}]   ;;  %s2119_s11 = inlined_call_operand.vmem [shape: bf16[2,32,128], index: 11, kind: input, shape index: {}]   ;;  %s2120_s12 = inlined_call_operand.vmem [shape: f32[2,1,128], index: 12, kind: input, shape index: {}]   ;;  %s2121_s13 = inlined_call_operand.vmem [shape: bf16[2,128,32], index: 13, kind: input, shape index: {}]   ;;  %s2122_s14 = inlined_call_operand.vmem [shape: f32[2,1,32], index: 14, kind: input, shape index: {}]   ;;  %s2123_s15 = inlined_call_operand.vmem [shape: f32[1,32], index: 15, kind: input, shape index: {}]   ;;  %s2124_s16 = inlined_call_operand.vmem [shape: f32[1,32], index: 16, kind: input, shape index: {}]   ;;  %s2125_s17 = inlined_call_operand.vmem [shape: bf16[32,128], index: 17, kind: input, shape index: {}]   ;;  %s2126_s18 = inlined_call_operand.vmem [shape: f32[1,128], index: 18, kind: input, shape index: {}]   ;;  %s2127_s19 = inlined_call_operand.hbm [shape: f32[16,128], index: 19, kind: output, shape index: {}]  }
   0x1   :  { %2130 = sst [smem:[#allocation7_spill]] %s2108_s0 }
   0x2   :  { %2131 = sst [smem:[#allocation8_spill]] %s2109_s1 }
   0x3   :  { %2132 = sst [smem:[#allocation9_spill]] %s2110_s2 }
   0x4   :  { %2133 = sst [smem:[#allocation10_spill]] %s2111_s3 }
   0x5   :  { %24 = vsyncpa [#allocation4], 0  ;;  %s1869_s0 = smov 0   ;;  %s1871_s30 = smov 0  }
   0x6   :  { %s1873_s20 = smov 0  }
   0x7 LB: > { %s39_s1 = sadd.s32 1, %s1754_s30  ;;  %p1434_p1 = scmp.ge.s32.totalorder %s1758_s20, 1  ;;  %s1758_s20 = sphi %s1873_s20, %s30_s20   ;;  %s1754_s30 = sphi %s1871_s30, %s2143_s30   ;;  %s1750_s0 = sphi %s1869_s0, %s2142_s0  }
   0x8   : > { %p40_p0 = scmp.ge.s32.totalorder %s39_s1, 2  ;;  %p551_p2 = scmp.lt.s32.totalorder %s1758_s20, 3 }
   0xa   : > { %s2145_s1 = smov (%p40_p0, %s39_s1), 0  ;;  %p552_p3 = pnand %p1434_p1, %p551_p2 }
   0xb   : > { %2134 = sst [smem:[#allocation6_spill]] %s2145_s1  ;;  %p1435_p4 = scmp.ne.s32.totalorder (!%p552_p3), %s1750_s0, 0 }
   0xc   : > { %555 = sbr.rel (%p552_p3) target bundleno = 2262 (0x8d6), region = 96 }
  0x11   : > { %613 = sbr.rel (%p1435_p4) target bundleno = 255 (0xff), region = 100  ;;  %s2135_s23 = sld [smem:[#allocation8_spill]] (!%p1435_p4) }
  0x12   : > { %s2136_s22 = sld [smem:[#allocation7_spill]] (!%p1435_p4) }
  0x13   : > { %s2137_s25 = sld [smem:[#allocation9_spill]] (!%p1435_p4) }
  0x16   : > { %v1760_v1 = vmov 0.0   ;;  %vm1761_vm0 = vmmov 0   ;;  %vm729_vm1 = vcmask 261120  }
  0x17   : > { %v1658_v0 = vld [vmem:[%s2135_s23 + $0x38] sm:$0xff]   ;;  %1535 = vmatprep.subr.bf16.mxu0 %v1760_v1  ;;  %v1659_v2 = vld [vmem:[%s2135_s23 + $0x30] sm:$0xff]   ;;  %1551 = vmatprep.mubr.msk.bf16.mxu0 %vm1761_vm0, %v1760_v1  ;;  %v1660_v3 = vld [vmem:[%s2135_s23 + $0x28] sm:$0xff]  }
  0x18   : > { %1536 = vmatpush3.bf16.msra.mxu0 %v1658_v0  ;;  %v1661_v4 = vld [vmem:[%s2135_s23 + $0x20] sm:$0xff]   ;;  %v1662_v5 = vld [vmem:[%s2135_s23 + $0x18] sm:$0xff]   ;;  %v1663_v6 = vld [vmem:[%s2135_s23 + $0x10] sm:$0xff]  }
  0x19   : > { %1537 = vmatprep.subr.bf16.mxu0 %v1760_v1  ;;  %v1664_v7 = vld [vmem:[%s2135_s23 + $0x8] sm:$0xff]   ;;  %v1665_v8 = vld [vmem:[%s2135_s23] sm:$0xff]  }
  0x1a   : > { %v614_v9 = vld [vmem:[%s2136_s22] sm:$0xff]  ;;  %v615_v10 = vld [vmem:[%s2136_s22 + $0x8] sm:$0xff] }
  0x1b   : > { %v616_v11 = vpack.c.bf16 %v615_v10, %v614_v9  ;;  %v1436_v12 = vld [vmem:[%s2137_s25] ss:$0 sm:$0xff] }
  0x1c   : > { %1538 = vmatpush3.bf16.msra.mxu0 %v1659_v2 }
  0x1d   : > { %1539 = vmatprep.subr.bf16.mxu0 %v1760_v1 }
  0x20   : > { %1540 = vmatpush3.bf16.msra.mxu0 %v1660_v3 }
  0x21   : > { %1541 = vmatprep.subr.bf16.mxu0 %v1760_v1 }
  0x24   : > { %1542 = vmatpush3.bf16.msra.mxu0 %v1661_v4 }
  0x25   : > { %1543 = vmatprep.subr.bf16.mxu0 %v1760_v1 }
  0x28   : > { %1544 = vmatpush3.bf16.msra.mxu0 %v1662_v5 }
  0x29   : > { %1545 = vmatprep.subr.bf16.mxu0 %v1760_v1 }
  0x2c   : > { %1546 = vmatpush3.bf16.msra.mxu0 %v1663_v6 }
  0x2d   : > { %1547 = vmatprep.subr.bf16.mxu0 %v1760_v1 }
  0x30   : > { %1548 = vmatpush3.bf16.msra.mxu0 %v1664_v7 }
  0x31   : > { %1549 = vmatprep.subr.bf16.mxu0 %v1760_v1 }
  0x34   : > { %1550 = vmatpush3.bf16.msra.mxu0 %v1665_v8 }
  0x37   : > { %1552 = vmatmul.mubr.bf16.vlgmr.msra.gmra.mxu0 %v616_v11 }
  0xf7   : > { %v722_v13 = vpop.f32.mrf.mxu0 }
  0xf8   : > { %v723_v14 = vadd.f32 %v1436_v12, %v722_v13 }
  0xf9   : > { %v1553_v15 = vpop.f32.mrf.mxu0 }
  0xfa   : > { %730 = vst.msk [vmem:[#allocation2] sm:$0xff] %vm729_vm1, %v723_v14 }
  0xfb   : > { %v725_v16 = vpop.f32.mrf.mxu0 }
  0xfc   : > { %v726_v17 = vadd.f32 %v1436_v12, %v725_v16 }
  0xfd   : > { %v1554_v18 = vpop.f32.mrf.mxu0 }
  0xfe   : > { %731 = vst.msk [vmem:[#allocation2 + $0x8] sm:$0xff] %vm729_vm1, %v726_v17 }
  0xff PF: > { %vm738_vm2 = vcmask 261120   ;;  %s1495_s21 = sshll.u32 %s1750_s0, 4  ;;  %v1762_v33 = vmov 0.0   ;;  %vm1763_vm3 = vmmov 0   ;;  %s1496_s27 = sshll.u32 %s1750_s0, 6 }
 0x100   : > { %1555 = vmatprep.subr.bf16.mxu1 %v1762_v33  ;;  %s785_s26 = scalar_lea.vmem %s2113_s5, %s1495_s21  ;;  %1559 = vmatprep.mubr.msk.bf16.mxu1 %vm1763_vm3, %v1762_v33  ;;  %s1956_s2 = scalar_lea.vmem %s2115_s7, %s1496_s27 }
 0x101   : > { %v1924_v19 = vld [vmem:[#allocation2] sm:$0xff]  ;;  %v1666_v34 = vld [vmem:[%s785_s26 + $0x8] sm:$0xff]   ;;  %1583 = vmatprep.subr.bf16.mxu0 %v1762_v33  ;;  %1587 = vmatprep.mubr.msk.bf16.mxu0 %vm1763_vm3, %v1762_v33  ;;  %s2138_s1 = sld [smem:[#allocation10_spill]]  ;;  %s736_s29 = scalar_lea.vmem %s2112_s4, %s1750_s0  ;;  %v1668_v52 = vld [vmem:[%s1956_s2 + $0x38] sm:$0xff]  }
 0x102   : > { %v739_v21 = vsel %vm738_vm2, %v1924_v19, 0.0  ;;  %1556 = vmatpush3.bf16.msra.mxu1 %v1666_v34  ;;  %v1667_v35 = vld [vmem:[%s785_s26] sm:$0xff]   ;;  %v1669_v54 = vld [vmem:[%s1956_s2 + $0x30] sm:$0xff]   ;;  %v1670_v55 = vld [vmem:[%s1956_s2 + $0x28] sm:$0xff]   ;;  %s1037_s24 = scalar_lea.vmem %s2119_s11, %s1495_s21  ;;  %p1483_p5 = scmp.eq.s32.totalorder %s1750_s0, 1 }
 0x103   : > { %740 = vadd.xlane.f32.xlu0 %v739_v21  ;;  %1557 = vmatprep.subr.bf16.mxu1 %v1762_v33  ;;  %v1446_v48 = vld [vmem:[%s736_s29] ss:$0 sm:$0xff]  ;;  %v1672_v57 = vld [vmem:[%s1956_s2 + $0x18] sm:$0xff]   ;;  %v1673_v58 = vld [vmem:[%s1956_s2 + $0x10] sm:$0xff]   ;;  %s991_s29 = scalar_lea.vmem %s2118_s10, %s1750_s0 }
 0x104   : > { %v1671_v56 = vld [vmem:[%s1956_s2 + $0x20] sm:$0xff]   ;;  %v1674_v59 = vld [vmem:[%s1956_s2 + $0x8] sm:$0xff]  }
 0x105   : > { %v1926_v20 = vld [vmem:[#allocation2 + $0x8] sm:$0xff]  ;;  %v1675_v60 = vld [vmem:[%s1956_s2] sm:$0xff]   ;;  %s876_s2 = scalar_lea.vmem %s2116_s8, %s1750_s0 }
 0x106   : > { %v742_v22 = vsel %vm738_vm2, %v1926_v20, 0.0  ;;  %1558 = vmatpush3.bf16.msra.mxu1 %v1667_v35  ;;  %v1455_v7 = vld [vmem:[%s876_s2] ss:$0 sm:$0xff]  ;;  %s989_s2 = scalar_lea.vmem %s2117_s9, %s1750_s0 }
 0x107   : > { %743 = vadd.xlane.f32.xlu0 %v742_v22  ;;  %1563 = vmatprep.subr.bf16.mxu1 %v1762_v33  ;;  %s734_s3 = scalar_lea.vmem %s2138_s1, %s1750_s0  ;;  %s790_s1 = scalar_lea.vmem %s2114_s6, %s1750_s0 }
 0x108   : > { %v1445_v44 = vld [vmem:[%s734_s3] ss:$0 sm:$0xff]  ;;  %s2020_s3 = scalar_lea.vmem %s2121_s13, %s1496_s27 }
 0x109   : > { %v1449_v61 = vld [vmem:[%s790_s1] ss:$0 sm:$0xff]  ;;  %s1042_s1 = scalar_lea.vmem %s2120_s12, %s1750_s0 }
 0x18c   : > { %v741_v23 = vpop.xlane.xlu0 %740 }
 0x18d   : > { %v746_v24 = vmul.f32 0.03125, %v741_v23 }
 0x18f   : > { %v748_v25 = vsub.f32 %v1924_v19, %v746_v24 }
 0x190   : > { %v744_v26 = vpop.xlane.xlu0 %743 }
 0x191   : > { %v747_v27 = vmul.f32 0.03125, %v744_v26  ;;  %v750_v28 = vmul.f32 %v748_v25, %v748_v25 }
 0x193   : > { %v749_v29 = vsub.f32 %v1926_v20, %v747_v27  ;;  %v752_v30 = vsel %vm738_vm2, %v750_v28, 0.0 }
 0x194   : > { %753 = vadd.xlane.f32.xlu1 %v752_v30 }
 0x195   : > { %v751_v31 = vmul.f32 %v749_v29, %v749_v29 }
 0x197   : > { %v755_v32 = vsel %vm738_vm2, %v751_v31, 0.0 }
 0x198   : > { %756 = vadd.xlane.f32.xlu1 %v755_v32 }
 0x21d   : > { %v754_v36 = vpop.xlane.xlu1 %753 }
 0x21e   : > { %v758_v37 = vmul.f32 0.03125, %v754_v36 }
 0x220   : > { %v760_v38 = vadd.f32 1e-05, %v758_v37 }
 0x221   : > { %v757_v39 = vpop.xlane.xlu1 %756 }
 0x222   : > { %1686 = vrsqrt.f32 %v760_v38  ;;  %v759_v40 = vmul.f32 0.03125, %v757_v39  ;;  %v1676_v39 = vld [vmem:[%s1037_s24 + $0x8] sm:$0xff]  }
 0x223   : > { %1584 = vmatpush3.bf16.msra.mxu0 %v1676_v39 }
 0x224   : > { %v761_v41 = vadd.f32 1e-05, %v759_v40  ;;  %v1677_v40 = vld [vmem:[%s1037_s24] sm:$0xff]   ;;  %1585 = vmatprep.subr.bf16.mxu0 %v1762_v33 }
 0x226   : > { %1688 = vrsqrt.f32 %v761_v41 }
 0x227   : > { %1586 = vmatpush3.bf16.msra.mxu0 %v1677_v40 }
 0x228   : > { %1591 = vmatprep.subr.bf16.mxu0 %v1762_v33 }
 0x22f   : > { %v1687_v42 = vpop.eup %1686 }
 0x230   : > { %v764_v43 = vmul.f32 %v1687_v42, %v748_v25 }
 0x232   : > { %v772_v47 = vmul.f32 %v1445_v44, %v764_v43 }
 0x233   : > { %v1689_v45 = vpop.eup %1688 }
 0x234   : > { %v765_v46 = vmul.f32 %v1689_v45, %v749_v29  ;;  %v780_v50 = vadd.f32 %v1446_v48, %v772_v47 }
 0x236   : > { %v773_v49 = vmul.f32 %v1445_v44, %v765_v46 }
 0x238   : > { %v781_v51 = vadd.f32 %v1446_v48, %v773_v49  ;;  %v1466_v49 = vld [vmem:[%s989_s2] ss:$0 sm:$0xff] }
 0x23a   : > { %v782_v53 = vpack.c.bf16 %v781_v51, %v780_v50 }
 0x23c   : > { %1560 = vmatmul.mubr.msk.bf16.vlgmr.msra.gmra.mxu1 %vm738_vm2, %v782_v53  ;;  %v1467_v53 = vld [vmem:[%s991_s29] ss:$0 sm:$0xff] }
 0x23d   : > { %1564 = vmatpush3.bf16.msra.mxu1 %v1668_v52  ;;  %1579 = vmatprep.mubr.msk.bf16.mxu1 %vm1763_vm3, %v1762_v33 }
 0x23e   : > { %1565 = vmatprep.subr.bf16.mxu1 %v1762_v33 }
 0x241   : > { %1566 = vmatpush3.bf16.msra.mxu1 %v1669_v54 }
 0x242   : > { %1567 = vmatprep.subr.bf16.mxu1 %v1762_v33 }
 0x245   : > { %1568 = vmatpush3.bf16.msra.mxu1 %v1670_v55 }
 0x246   : > { %1569 = vmatprep.subr.bf16.mxu1 %v1762_v33 }
 0x249   : > { %1570 = vmatpush3.bf16.msra.mxu1 %v1671_v56 }
 0x24a   : > { %1571 = vmatprep.subr.bf16.mxu1 %v1762_v33 }
 0x24d   : > { %1572 = vmatpush3.bf16.msra.mxu1 %v1672_v57  ;;  %v1678_v57 = vld [vmem:[%s2020_s3 + $0x38] sm:$0xff]  }
 0x24e   : > { %1573 = vmatprep.subr.bf16.mxu1 %v1762_v33 }
 0x251   : > { %1574 = vmatpush3.bf16.msra.mxu1 %v1673_v58 }
 0x252   : > { %1575 = vmatprep.subr.bf16.mxu1 %v1762_v33 }
 0x255   : > { %1576 = vmatpush3.bf16.msra.mxu1 %v1674_v59  ;;  %v1679_v59 = vld [vmem:[%s2020_s3 + $0x30] sm:$0xff]  }
 0x256   : > { %1577 = vmatprep.subr.bf16.mxu1 %v1762_v33 }
 0x259   : > { %1578 = vmatpush3.bf16.msra.mxu1 %v1675_v60  ;;  %v1680_v60 = vld [vmem:[%s2020_s3 + $0x28] sm:$0xff]  }
 0x2fc   : > { %v847_v62 = vpop.f32.mrf.mxu1 }
 0x2fd   : > { %v848_v0 = vadd.f32 %v1449_v61, %v847_v62  ;;  %v1682_v62 = vld [vmem:[%s2020_s3 + $0x18] sm:$0xff]  }
 0x2fe   : > { %v1561_v63 = vpop.f32.mrf.mxu1 }
 0x2ff   : > { %v854_v4 = vmax.f32 %v848_v0, 0.0  ;;  %v1683_v63 = vld [vmem:[%s2020_s3 + $0x10] sm:$0xff]   ;;  %v1684_v0 = vld [vmem:[%s2020_s3 + $0x8] sm:$0xff]  }
 0x300   : > { %v850_v1 = vpop.f32.mrf.mxu1 }
 0x301   : > { %v851_v2 = vadd.f32 %v1449_v61, %v850_v1  ;;  %v1681_v61 = vld [vmem:[%s2020_s3 + $0x20] sm:$0xff]  }
 0x302   : > { %v1562_v3 = vpop.f32.mrf.mxu1  ;;  %v1685_v1 = vld [vmem:[%s2020_s3] sm:$0xff]   ;;  %s1127_s3 = scalar_lea.vmem %s2122_s14, %s1750_s0 }
 0x303   : > { %v855_v5 = vmax.f32 %v851_v2, 0.0  ;;  %v1469_v2 = vld [vmem:[%s1042_s1] ss:$0 sm:$0xff] }
 0x305   : > { %v856_v6 = vpack.c.bf16 %v855_v5, %v854_v4 }
 0x307   : > { %1580 = vmatmul.mubr.bf16.vlgmr.msra.gmra.mxu1 %v856_v6 }
 0x3c7   : > { %v966_v8 = vpop.f32.mrf.mxu1 }
 0x3c8   : > { %v967_v9 = vadd.f32 %v1455_v7, %v966_v8 }
 0x3c9   : > { %v1581_v10 = vpop.f32.mrf.mxu1 }
 0x3ca   : > { %v1464_v11 = vmul.f32 -1.442695, %v967_v9 }
 0x3cb   : > { %v969_v12 = vpop.f32.mrf.mxu1 }
 0x3cc   : > { %1690 = vpow2.f32 %v1464_v11  ;;  %v970_v13 = vadd.f32 %v1455_v7, %v969_v12 }
 0x3cd   : > { %v1582_v14 = vpop.f32.mrf.mxu1 }
 0x3ce   : > { %v1465_v15 = vmul.f32 -1.442695, %v970_v13 }
 0x3d0   : > { %1692 = vpow2.f32 %v1465_v15 }
 0x3d9   : > { %v1691_v16 = vpop.eup %1690 }
 0x3da   : > { %v979_v17 = vadd.f32 1.0, %v1691_v16 }
 0x3dc   : > { %1694 = vrcp.f32 %v979_v17 }
 0x3dd   : > { %v1693_v18 = vpop.eup %1692 }
 0x3de   : > { %v980_v21 = vadd.f32 1.0, %v1693_v18 }
 0x3e0   : > { %1696 = vrcp.f32 %v980_v21 }
 0x3e9   : > { %v1695_v22 = vpop.eup %1694 }
 0x3ea   : > { %v985_v23 = vmul.f32 %v1695_v22, %v1924_v19 }
 0x3ec   : > { %v1994_v24 = vadd.f32 %v985_v23, %v1924_v19 }
 0x3ed   : > { %v1697_v25 = vpop.eup %1696 }
 0x3ee   : > { %v993_v26 = vsel %vm738_vm2, %v1994_v24, 0.0  ;;  %v986_v27 = vmul.f32 %v1697_v25, %v1926_v20 }
 0x3ef   : > { %994 = vadd.xlane.f32.xlu0 %v993_v26 }
 0x3f0   : > { %v2000_v28 = vadd.f32 %v986_v27, %v1926_v20 }
 0x3f2   : > { %v996_v29 = vsel %vm738_vm2, %v2000_v28, 0.0 }
 0x3f3   : > { %997 = vadd.xlane.f32.xlu1 %v996_v29 }
 0x478   : > { %v995_v30 = vpop.xlane.xlu0 %994 }
 0x479   : > { %v999_v31 = vmul.f32 0.03125, %v995_v30 }
 0x47b   : > { %v1001_v19 = vsub.f32 %v1994_v24, %v999_v31 }
 0x47c   : > { %v998_v32 = vpop.xlane.xlu1 %997 }
 0x47d   : > { %v1000_v34 = vmul.f32 0.03125, %v998_v32  ;;  %v1003_v35 = vmul.f32 %v1001_v19, %v1001_v19 }
 0x47f   : > { %v1002_v36 = vsub.f32 %v2000_v28, %v1000_v34  ;;  %v1005_v37 = vsel %vm738_vm2, %v1003_v35, 0.0 }
 0x480   : > { %1006 = vadd.xlane.f32.xlu0 %v1005_v37 }
 0x481   : > { %v1004_v38 = vmul.f32 %v1002_v36, %v1002_v36 }
 0x483   : > { %v1008_v20 = vsel %vm738_vm2, %v1004_v38, 0.0 }
 0x484   : > { %1009 = vadd.xlane.f32.xlu1 %v1008_v20 }
 0x509   : > { %v1007_v41 = vpop.xlane.xlu0 %1006 }
 0x50a   : > { %v1011_v42 = vmul.f32 0.03125, %v1007_v41 }
 0x50c   : > { %v1013_v43 = vadd.f32 1e-05, %v1011_v42 }
 0x50d   : > { %v1010_v44 = vpop.xlane.xlu1 %1009 }
 0x50e   : > { %1698 = vrsqrt.f32 %v1013_v43  ;;  %v1012_v45 = vmul.f32 0.03125, %v1010_v44 }
 0x510   : > { %v1014_v46 = vadd.f32 1e-05, %v1012_v45 }
 0x512   : > { %1700 = vrsqrt.f32 %v1014_v46 }
 0x51b   : > { %v1699_v47 = vpop.eup %1698 }
 0x51c   : > { %v1017_v48 = vmul.f32 %v1699_v47, %v1001_v19 }
 0x51e   : > { %v1025_v52 = vmul.f32 %v1466_v49, %v1017_v48 }
 0x51f   : > { %v1701_v50 = vpop.eup %1700 }
 0x520   : > { %v1018_v51 = vmul.f32 %v1701_v50, %v1002_v36  ;;  %v1033_v55 = vadd.f32 %v1467_v53, %v1025_v52 }
 0x522   : > { %v1026_v54 = vmul.f32 %v1466_v49, %v1018_v51 }
 0x524   : > { %v1034_v56 = vadd.f32 %v1467_v53, %v1026_v54 }
 0x526   : > { %v1035_v58 = vpack.c.bf16 %v1034_v56, %v1033_v55 }
 0x528   : > { %1588 = vmatmul.mubr.msk.bf16.vlgmr.msra.gmra.mxu0 %vm738_vm2, %v1035_v58 }
 0x529   : > { %1592 = vmatpush3.bf16.msra.mxu0 %v1678_v57  ;;  %1607 = vmatprep.mubr.msk.bf16.mxu0 %vm1763_vm3, %v1762_v33 }
 0x52a   : > { %1593 = vmatprep.subr.bf16.mxu0 %v1762_v33 }
 0x52d   : > { %1594 = vmatpush3.bf16.msra.mxu0 %v1679_v59 }
 0x52e   : > { %1595 = vmatprep.subr.bf16.mxu0 %v1762_v33 }
 0x531   : > { %1596 = vmatpush3.bf16.msra.mxu0 %v1680_v60 }
 0x532   : > { %1597 = vmatprep.subr.bf16.mxu0 %v1762_v33 }
 0x535   : > { %1598 = vmatpush3.bf16.msra.mxu0 %v1681_v61 }
 0x536   : > { %1599 = vmatprep.subr.bf16.mxu0 %v1762_v33 }
 0x539   : > { %1600 = vmatpush3.bf16.msra.mxu0 %v1682_v62 }
 0x53a   : > { %1601 = vmatprep.subr.bf16.mxu0 %v1762_v33 }
 0x53d   : > { %1602 = vmatpush3.bf16.msra.mxu0 %v1683_v63 }
 0x53e   : > { %1603 = vmatprep.subr.bf16.mxu0 %v1762_v33 }
 0x541   : > { %1604 = vmatpush3.bf16.msra.mxu0 %v1684_v0 }
 0x542   : > { %1605 = vmatprep.subr.bf16.mxu0 %v1762_v33  ;;  %v1474_v33 = vld [vmem:[%s1127_s3] ss:$0 sm:$0xff] }
 0x545   : > { %1606 = vmatpush3.bf16.msra.mxu0 %v1685_v1 }
 0x5e8   : > { %v1099_v3 = vpop.f32.mrf.mxu0 }
 0x5e9   : > { %v1100_v5 = vadd.f32 %v1469_v2, %v1099_v3 }
 0x5ea   : > { %v1589_v4 = vpop.f32.mrf.mxu0 }
 0x5eb   : > { %v1106_v9 = vmax.f32 %v1100_v5, 0.0 }
 0x5ec   : > { %v1102_v6 = vpop.f32.mrf.mxu0 }
 0x5ed   : > { %v1103_v7 = vadd.f32 %v1469_v2, %v1102_v6 }
 0x5ee   : > { %v1590_v8 = vpop.f32.mrf.mxu0 }
 0x5ef   : > { %v1107_v10 = vmax.f32 %v1103_v7, 0.0 }
 0x5f1   : > { %v1108_v11 = vpack.c.bf16 %v1107_v10, %v1106_v9 }
 0x5f3   : > { %1608 = vmatmul.mubr.bf16.vlgmr.msra.gmra.mxu0 %v1108_v11 }
 0x6b3   : > { %v1217_v12 = vpop.f32.mrf.mxu0 }
 0x6b4   : > { %v1218_v13 = vadd.f32 %v1474_v33, %v1217_v12 }
 0x6b5   : > { %v1609_v14 = vpop.f32.mrf.mxu0 }
 0x6b6   : > { %v1224_v15 = vadd.f32 %v1218_v13, %v1994_v24  ;;  %1229 = sbr.rel (%p1483_p5) target bundleno = 1725 (0x6bd), region = 104 }
 0x6b7   : > { %v1220_v16 = vpop.f32.mrf.mxu0 }
 0x6b8   : > { %v1221_v17 = vadd.f32 %v1474_v33, %v1220_v16 }
 0x6b9   : > { %v1610_v18 = vpop.f32.mrf.mxu0 }
 0x6ba   : > { %v1225_v21 = vadd.f32 %v1221_v17, %v2000_v28 }
 0x6bb   : > { %1230 = vst.msk [vmem:[#allocation2] sm:$0xff] %vm738_vm2, %v1224_v15 }
 0x6bc   : > { %1231 = vst.msk [vmem:[#allocation2 + $0x8] sm:$0xff] %vm738_vm2, %v1225_v21 }
 0x6bd PF: > { %p1484_p6 = scmp.ne.s32.totalorder %s1750_s0, 1 }
 0x6bf   : > { %1235 = sbr.rel (%p1484_p6) target bundleno = 2246 (0x8c6), region = 108 }
 0x6c4   : > { %v1238_v22 = vsel %vm738_vm2, %v1224_v15, 0.0  ;;  %v1241_v23 = vsel %vm738_vm2, %v1225_v21, 0.0  ;;  %v1702_v34 = vld [vmem:[%s2125_s17 + $0x8] sm:$0xff]   ;;  %v1764_v35 = vmov 0.0   ;;  %vm1765_vm4 = vmmov 0   ;;  %v1703_v36 = vld [vmem:[%s2125_s17] sm:$0xff]  }
 0x6c5   : > { %1239 = vadd.xlane.f32.xlu0 %v1238_v22  ;;  %1611 = vmatprep.subr.bf16.mxu0 %v1764_v35  ;;  %v1485_v44 = vld [vmem:[%s2123_s15] ss:$0 sm:$0xff] }
 0x6c6   : > { %1615 = vmatprep.mubr.msk.bf16.mxu0 %vm1765_vm4, %v1764_v35  ;;  %1612 = vmatpush3.bf16.msra.mxu0 %v1702_v34  ;;  %v1486_v48 = vld [vmem:[%s2124_s16] ss:$0 sm:$0xff] }
 0x6c7   : > { %1613 = vmatprep.subr.bf16.mxu0 %v1764_v35  ;;  %v1487_v53 = vld [vmem:[%s2126_s18] ss:$0 sm:$0xff] }
 0x6c9   : > { %1242 = vadd.xlane.f32.xlu0 %v1241_v23 }
 0x6ca   : > { %1614 = vmatpush3.bf16.msra.mxu0 %v1703_v36 }
 0x74e   : > { %v1240_v24 = vpop.xlane.xlu0 %1239 }
 0x74f   : > { %v1244_v25 = vmul.f32 0.03125, %v1240_v24 }
 0x751   : > { %v1246_v26 = vsub.f32 %v1224_v15, %v1244_v25 }
 0x752   : > { %v1243_v27 = vpop.xlane.xlu0 %1242 }
 0x753   : > { %v1245_v28 = vmul.f32 0.03125, %v1243_v27  ;;  %v1248_v29 = vmul.f32 %v1246_v26, %v1246_v26 }
 0x755   : > { %v1247_v30 = vsub.f32 %v1225_v21, %v1245_v28  ;;  %v1250_v31 = vsel %vm738_vm2, %v1248_v29, 0.0 }
 0x756   : > { %1251 = vadd.xlane.f32.xlu1 %v1250_v31 }
 0x757   : > { %v1249_v19 = vmul.f32 %v1247_v30, %v1247_v30 }
 0x759   : > { %v1253_v32 = vsel %vm738_vm2, %v1249_v19, 0.0 }
 0x75a   : > { %1254 = vadd.xlane.f32.xlu1 %v1253_v32 }
 0x7df   : > { %v1252_v37 = vpop.xlane.xlu1 %1251 }
 0x7e0   : > { %v1256_v38 = vmul.f32 0.03125, %v1252_v37 }
 0x7e2   : > { %v1258_v20 = vadd.f32 1e-05, %v1256_v38 }
 0x7e3   : > { %v1255_v39 = vpop.xlane.xlu1 %1254 }
 0x7e4   : > { %1704 = vrsqrt.f32 %v1258_v20  ;;  %v1257_v40 = vmul.f32 0.03125, %v1255_v39 }
 0x7e6   : > { %v1259_v41 = vadd.f32 1e-05, %v1257_v40 }
 0x7e8   : > { %1706 = vrsqrt.f32 %v1259_v41 }
 0x7f1   : > { %v1705_v42 = vpop.eup %1704 }
 0x7f2   : > { %v1262_v43 = vmul.f32 %v1705_v42, %v1246_v26 }
 0x7f4   : > { %v1270_v47 = vmul.f32 %v1485_v44, %v1262_v43 }
 0x7f5   : > { %v1707_v45 = vpop.eup %1706 }
 0x7f6   : > { %v1263_v46 = vmul.f32 %v1707_v45, %v1247_v30  ;;  %v1278_v50 = vadd.f32 %v1486_v48, %v1270_v47 }
 0x7f8   : > { %v1271_v49 = vmul.f32 %v1485_v44, %v1263_v46 }
 0x7fa   : > { %v1279_v51 = vadd.f32 %v1486_v48, %v1271_v49 }
 0x7fc   : > { %v1280_v52 = vpack.c.bf16 %v1279_v51, %v1278_v50 }
 0x7fe   : > { %1616 = vmatmul.mubr.msk.bf16.vlgmr.msra.gmra.mxu0 %vm738_vm2, %v1280_v52 }
 0x8be   : > { %v1341_v54 = vpop.f32.mrf.mxu0 }
 0x8bf   : > { %v1342_v55 = vadd.f32 %v1487_v53, %v1341_v54 }
 0x8c0   : > { %v1617_v56 = vpop.f32.mrf.mxu0 }
 0x8c1   : > { %1348 = vst [vmem:[#allocation3] sm:$0xff] %v1342_v55 }
 0x8c2   : > { %v1344_v57 = vpop.f32.mrf.mxu0 }
 0x8c3   : > { %v1345_v58 = vadd.f32 %v1487_v53, %v1344_v57 }
 0x8c4   : > { %v1618_v59 = vpop.f32.mrf.mxu0 }
 0x8c5   : > { %1349 = vst [vmem:[#allocation3 + $0x8] sm:$0xff] %v1345_v58 }
 0x8c6 PF: > { %s2139_s3 = sadd.s32 4294967295, %s1758_s20   ;;  %s1766_s2 = smov [#allocation3]  }
 0x8c7   : > { %p2084_p7 = scmp.eq.s32.totalorder %s2139_s3, 1  ;;  %s1359_s28 = sshll.u32 %s1766_s2, 4  ;;  %s1360_s28 = int_to_ptr.vmem [resolvable:$true] %s1359_s28 }
 0x8c8   : > { %s1708_s27 = scalar_lea.vmem %s1360_s28, 256  ;;  %p1715_p11 = scmp.lt.s32.totalorder %s1360_s28, %s1360_s28 }
 0x8c9   : > { %p1709_p8 = scmp.ne.s32.totalorder %s1360_s28, %s1708_s27  ;;  %p1716_p12 = scmp.lt.s32.totalorder %s1708_s27, %s1708_s27 }
 0x8cb   : > { %p1710_p9 = pnand %p1709_p8, %p2084_p7  ;;  %p1717_p13 = por %p1716_p12, %p1715_p11 }
 0x8cd   : > { %p1711_p10 = pneg %p1710_p9 }
 0x8cf   : > { %p1718_p0 = pnand %p1717_p13, %p1711_p10 }
 0x8d1   : > { %1721 = shalt.err (!%p1718_p0)
}
 0x8d2   : > { %s1767_s29 = smov 128   ;;  %s1768_s24 = smov 8  }
 0x8d3   : > { %1620 = dma.vmem_to_hbm [thread:$0]  (%p2084_p7), %s1360_s28, 256, %s2127_s19, [#allocation4], %s1767_s29, %s1767_s29, %s1768_s24  }
 0x8d4   : > { %1745 = dma.done.wait (%p2084_p7), [#allocation4], 256  }
 0x8d5   : > { %1747 = vsyncadd (%p2084_p7), [#allocation4], 4294967040 }
 0x8d6 PF: > { %s30_s20 = sadd.s32 1, %s1758_s20   ;;  %s2141_s21 = sld [smem:[#allocation6_spill]] }
 0x8d7   : > { %p27_p1 = scmp.ge.s32.totalorder %s30_s20, 4   ;;  %s2142_s0 = smov %s1754_s30 }
 0x8d9   :  { %29 = sbr.rel (!%p27_p1) target bundleno = 7 (0x7), region = 148 }
 0x8dc   : > { %s2143_s30 = smov %s2141_s21 }
 0x8de   :  { %1375 = vsyncpa [#allocation4], 1 }
 0x8df   :  { %1377 = vsyncpa [#allocation4 + $0x1], 1 }

</bundles_post_ra>
